<compile_context>
chip_gen: v6e
topology: v6e:2x2x1
jax: 0.10.0
libtpu: 0.0.40
codegen_flags: <defaults>
</compile_context>

<pallas_src>
import functools

import jax
import jax.numpy as jnp
from jax import lax
from jax.experimental import pallas as pl
from jax.experimental.pallas import tpu as pltpu


# ---------------------------------------------------------------------------
# Pass 1: per-view normalization (each column normalized exactly once).
# ---------------------------------------------------------------------------
def _norm_kernel(out_ref, h1n_ref, h2n_ref, *, batch_size):
    x = out_ref[...].astype(jnp.float32)                 # (2N, tile) f32
    inv_n = jnp.float32(1.0 / batch_size)

    def _normalize(h):
        # Two-pass stats; fold the unbiased-std 1/(N-1) and the C/(N-1) into
        # one rsqrt.  A zero-variance column gives inf/nan, matching the
        # PyTorch reference behaviour.
        mean = jnp.sum(h, axis=0, keepdims=True) * inv_n
        d = h - mean
        css = jnp.sum(d * d, axis=0, keepdims=True)      # sum((h - mean)^2)
        return d * lax.rsqrt(css)

    h1n_ref[...] = _normalize(x[:batch_size]).astype(h1n_ref.dtype)
    h2n_ref[...] = _normalize(x[batch_size:]).astype(h2n_ref.dtype)


# ---------------------------------------------------------------------------
# Pass 2: blocked cross-correlation + loss reduction.
# ---------------------------------------------------------------------------
def _bt_kernel(h1n_ref, h2n_ref, o_ref, *, lam):
    i = pl.program_id(0)                  # row block of C
    j = pl.program_id(1)                  # col block of C
    tm = h1n_ref.shape[1]
    tn = h2n_ref.shape[1]
    lam_f = jnp.float32(lam)

    # C block = h1n^T @ h2n, contracting the batch axis (bf16 MXU, f32 acc).
    c_blk = lax.dot_general(
        h1n_ref[...], h2n_ref[...],
        dimension_numbers=(((0,), (0,)), ((), ())),
        preferred_element_type=jnp.float32,
    )                                     # (tm, tn) f32

    contrib = lam_f * jnp.sum(c_blk * c_blk)

    # The per-i output block stays resident across the j reduction axis.
    @pl.when(j == 0)
    def _():
        o_ref[...] = jnp.zeros_like(o_ref)

    o_ref[0, 0] += contrib

    # Diagonal correction, computed from the SAME C values (exact algebraic
    # cancellation): add (C_pp - 1)^2 - lam * C_pp^2 per diagonal element.
    row0 = i * tm
    col0 = j * tn

    @pl.when(jnp.logical_and(row0 < col0 + tn, col0 < row0 + tm))
    def _():
        rows = row0 + lax.broadcasted_iota(jnp.int32, (tm, tn), 0)
        cols = col0 + lax.broadcasted_iota(jnp.int32, (tm, tn), 1)
        corr = jnp.where(rows == cols,
                         (c_blk - 1.0) ** 2 - lam_f * (c_blk * c_blk),
                         0.0)
        o_ref[0, 0] += jnp.sum(corr)


# ---------------------------------------------------------------------------
# Wrapper: tile selection, VMEM budgeting, pallas_call plumbing.
# ---------------------------------------------------------------------------
def _vmem_capacity_bytes():
    try:
        return int(pltpu.get_tpu_info().vmem_capacity_bytes)
    except Exception:
        return 64 * 1024 * 1024           # conservative (v7x per-TC VMEM)


def _main_vmem_bytes(n, tdi, tdj, op_bytes):
    # 2 pipeline buffers per input + output block buffers + f32 temporaries.
    return (2 * n * tdi * op_bytes + 2 * n * tdj * op_bytes
            + 2 * 8 * 128 * 4 + 4 * tdi * tdj * 4)


def _pick_tiles(n, d, op_bytes, budget):
    cands = [t for t in (512, 256, 128) if d % t == 0] or [d]
    # Row tiles: prefer >= 2 blocks so the "parallel" axis feeds both v7x TCs.
    tile_di = None
    for t in cands:
        if d // t >= 2 and _main_vmem_bytes(n, t, cands[-1], op_bytes) <= budget:
            tile_di = t
            break
    if tile_di is None:
        tile_di = next((t for t in cands
                        if _main_vmem_bytes(n, t, cands[-1], op_bytes) <= budget),
                       cands[-1])
    # Col tiles: make h2 fully VMEM-resident (DMA'd once) when it fits,
    # otherwise stream with the widest tile that fits the budget.
    for t in [d] + cands:
        if _main_vmem_bytes(n, tile_di, t, op_bytes) <= budget:
            return tile_di, t
    return tile_di, cands[-1]


def _compiler_params(semantics, est_bytes, cap):
    limit = int(min(cap, max(2 * est_bytes + (8 << 20), 32 << 20)))
    return pltpu.CompilerParams(dimension_semantics=semantics,
                                vmem_limit_bytes=limit)


def barlow_twins_loss(output, batch_size, lam=0.5, *,
                      tile_di=None, tile_dj=None, norm_tile=None,
                      op_dtype=jnp.bfloat16):
    """output: (2*batch_size, D) float array -> scalar float32 loss."""
    assert output.ndim == 2 and output.shape[0] == 2 * batch_size
    n = batch_size
    d = output.shape[1]
    # TODO(synk): pad / mask feature dims that are not a multiple of 128.
    assert d % 128 == 0, "feature dim must be lane-dense (multiple of 128)"

    op_bytes = jnp.dtype(op_dtype).itemsize
    cap = _vmem_capacity_bytes()
    budget = int(0.7 * cap)

    # ---------------- pass 1: normalize both views once ----------------
    if norm_tile is None:
        norm_tile = next((t for t in (512, 256, 128)
                          if d % t == 0 and 56 * n * t <= budget), 128)
    assert d % norm_tile == 0
    norm_est = (2 * 2 * n * norm_tile * 4             # input blocks (x2 bufs)
                + 2 * 2 * n * norm_tile * op_bytes    # two outputs (x2 bufs)
                + 8 * 2 * n * norm_tile * 4)          # f32 temporaries
    h1n, h2n = pl.pallas_call(
        functools.partial(_norm_kernel, batch_size=n),
        out_shape=(jax.ShapeDtypeStruct((n, d), op_dtype),
                   jax.ShapeDtypeStruct((n, d), op_dtype)),
        grid=(d // norm_tile,),
        in_specs=[pl.BlockSpec((2 * n, norm_tile), lambda i: (0, i))],
        out_specs=(pl.BlockSpec((n, norm_tile), lambda i: (0, i)),
                   pl.BlockSpec((n, norm_tile), lambda i: (0, i))),
        compiler_params=_compiler_params(("parallel",), norm_est, cap),
    )(output)

    # ------------- pass 2: blocked C and the loss reduction -------------
    auto_di, auto_dj = _pick_tiles(n, d, op_bytes, budget)
    tile_di = auto_di if tile_di is None else tile_di
    tile_dj = auto_dj if tile_dj is None else tile_dj
    assert d % tile_di == 0 and d % tile_dj == 0
    gd_i, gd_j = d // tile_di, d // tile_dj

    main_est = _main_vmem_bytes(n, tile_di, tile_dj, op_bytes)
    out = pl.pallas_call(
        functools.partial(_bt_kernel, lam=float(lam)),
        out_shape=jax.ShapeDtypeStruct((gd_i * 8, 128), jnp.float32),
        grid=(gd_i, gd_j),
        in_specs=[
            pl.BlockSpec((n, tile_di), lambda i, j: (0, i)),
            pl.BlockSpec((n, tile_dj), lambda i, j: (0, j)),
        ],
        out_specs=pl.BlockSpec((8, 128), lambda i, j: (i, 0)),
        compiler_params=_compiler_params(("parallel", "arbitrary"),
                                         main_est, cap),
    )(h1n, h2n)

    return jnp.sum(out)


# ---------------------------------------------------------------------------
# Pure-JAX f32 reference mirroring the PyTorch forward (unbiased std).
# ---------------------------------------------------------------------------
def _reference(output, batch_size, lam=0.5):
    h1, h2 = output[:batch_size], output[batch_size:]
    h1 = (h1 - h1.mean(0, keepdims=True)) / h1.std(0, ddof=1, keepdims=True)
    h2 = (h2 - h2.mean(0, keepdims=True)) / h2.std(0, ddof=1, keepdims=True)
    n, d = h1.shape
    c = (h1.T @ h2) / (n - 1)
    eye = jnp.eye(d, dtype=jnp.float32)
    c_diff = (c - eye) ** 2
    c_diff = jnp.where(eye.astype(bool), c_diff, c_diff * lam)
    return c_diff.sum()


if __name__ == "__main__":
    batch_size = 16      # N multiple of 8 -> aligned static row split
    feat_dim = 256       # multiple of 128 -> lane-dense blocks
    lam = 0.5

    key = jax.random.PRNGKey(0)
    output = (jax.random.normal(key, (2 * batch_size, feat_dim),
                                dtype=jnp.float32)
              + 0.5)     # nonzero column means exercise the centering path

    ref = _reference(output, batch_size, lam)

    # Auto config: 2 row blocks ("parallel"), h2 fully VMEM-resident.
    loss = barlow_twins_loss(output, batch_size, lam)
    jax.block_until_ready(loss)
    assert bool(jnp.isfinite(loss)), loss
    assert jnp.allclose(loss, ref, rtol=2e-2, atol=1e-1), (loss, ref)

    # Also exercise the streamed-h2 (2-D grid) path explicitly.
    loss_streamed = barlow_twins_loss(output, batch_size, lam,
                                      tile_di=128, tile_dj=128)
    jax.block_until_ready(loss_streamed)
    assert jnp.allclose(loss_streamed, ref, rtol=2e-2, atol=1e-1), (
        loss_streamed, ref)

    print("KERNEL_OK")
</pallas_src>

<mosaic_0001>
module attributes {stable_mosaic.version = 11 : i64} {
  func.func @_norm_kernel(%arg0: i32, %arg1: memref<32x256xf32, #tpu.memory_space<vmem>>, %arg2: memref<16x256xbf16, #tpu.memory_space<vmem>>, %arg3: memref<16x256xbf16, #tpu.memory_space<vmem>>) attributes {dimension_semantics = [#tpu.dimension_semantics<parallel>], iteration_bounds = array<i64: 1>, scalar_prefetch = 0 : i64, scratch_operands = 0 : i64, tpu.core_type = #tpu.core_type<tc>, window_params = [{transform_indices = @transform_0, window_bounds = array<i64: 32, 256>}, {transform_indices = @transform_1, window_bounds = array<i64: 16, 256>}, {transform_indices = @transform_2, window_bounds = array<i64: 16, 256>}]} {
    %c0 = arith.constant 0 : index
    %c0_0 = arith.constant 0 : index
    %0 = vector.load %arg1[%c0, %c0_0] : memref<32x256xf32, #tpu.memory_space<vmem>>, vector<32x256xf32>
    %1 = vector.extract_strided_slice %0 {offsets = [0, 0], sizes = [16, 256], strides = [1, 1]} : vector<32x256xf32> to vector<16x256xf32>
    %cst = arith.constant dense<0.000000e+00> : vector<256xf32>
    %2 = vector.multi_reduction <add>, %1, %cst [0] : vector<16x256xf32> to vector<256xf32>
    %3 = vector.shape_cast %2 : vector<256xf32> to vector<1x256xf32>
    %cst_1 = arith.constant 6.250000e-02 : f32
    %4 = vector.broadcast %cst_1 : f32 to vector<1x256xf32>
    %5 = arith.mulf %3, %4 : vector<1x256xf32>
    %6 = vector.broadcast %5 : vector<1x256xf32> to vector<16x256xf32>
    %7 = arith.subf %1, %6 : vector<16x256xf32>
    %8 = arith.mulf %7, %7 : vector<16x256xf32>
    %cst_2 = arith.constant dense<0.000000e+00> : vector<256xf32>
    %9 = vector.multi_reduction <add>, %8, %cst_2 [0] : vector<16x256xf32> to vector<256xf32>
    %10 = vector.shape_cast %9 : vector<256xf32> to vector<1x256xf32>
    %11 = math.rsqrt %10 : vector<1x256xf32>
    %12 = vector.broadcast %11 : vector<1x256xf32> to vector<16x256xf32>
    %13 = arith.mulf %7, %12 : vector<16x256xf32>
    %14 = arith.truncf %13 : vector<16x256xf32> to vector<16x256xbf16>
    %c0_3 = arith.constant 0 : index
    %c0_4 = arith.constant 0 : index
    %15 = vector.load %arg2[%c0_3, %c0_4] : memref<16x256xbf16, #tpu.memory_space<vmem>>, vector<16x256xbf16>
    tpu.vector_store %arg2[%c0_3, %c0_4], %14 {strides = array<i32>} : memref<16x256xbf16, #tpu.memory_space<vmem>>, vector<16x256xbf16>,
    %16 = vector.extract_strided_slice %0 {offsets = [16, 0], sizes = [16, 256], strides = [1, 1]} : vector<32x256xf32> to vector<16x256xf32>
    %cst_5 = arith.constant dense<0.000000e+00> : vector<256xf32>
    %17 = vector.multi_reduction <add>, %16, %cst_5 [0] : vector<16x256xf32> to vector<256xf32>
    %18 = vector.shape_cast %17 : vector<256xf32> to vector<1x256xf32>
    %cst_6 = arith.constant 6.250000e-02 : f32
    %19 = vector.broadcast %cst_6 : f32 to vector<1x256xf32>
    %20 = arith.mulf %18, %19 : vector<1x256xf32>
    %21 = vector.broadcast %20 : vector<1x256xf32> to vector<16x256xf32>
    %22 = arith.subf %16, %21 : vector<16x256xf32>
    %23 = arith.mulf %22, %22 : vector<16x256xf32>
    %cst_7 = arith.constant dense<0.000000e+00> : vector<256xf32>
    %24 = vector.multi_reduction <add>, %23, %cst_7 [0] : vector<16x256xf32> to vector<256xf32>
    %25 = vector.shape_cast %24 : vector<256xf32> to vector<1x256xf32>
    %26 = math.rsqrt %25 : vector<1x256xf32>
    %27 = vector.broadcast %26 : vector<1x256xf32> to vector<16x256xf32>
    %28 = arith.mulf %22, %27 : vector<16x256xf32>
    %29 = arith.truncf %28 : vector<16x256xf32> to vector<16x256xbf16>
    %c0_8 = arith.constant 0 : index
    %c0_9 = arith.constant 0 : index
    %30 = vector.load %arg3[%c0_8, %c0_9] : memref<16x256xbf16, #tpu.memory_space<vmem>>, vector<16x256xbf16>
    tpu.vector_store %arg3[%c0_8, %c0_9], %29 {strides = array<i32>} : memref<16x256xbf16, #tpu.memory_space<vmem>>, vector<16x256xbf16>,
    return
  }
  func.func @transform_0(%arg0: i32) -> (i32, i32) {
    %c0_i32 = arith.constant 0 : i32
    %c0_i32_0 = arith.constant 0 : i32
    return %c0_i32, %arg0 : i32, i32
  }
  func.func @transform_1(%arg0: i32) -> (i32, i32) {
    %c0_i32 = arith.constant 0 : i32
    %c0_i32_0 = arith.constant 0 : i32
    return %c0_i32, %arg0 : i32, i32
  }
  func.func @transform_2(%arg0: i32) -> (i32, i32) {
    %c0_i32 = arith.constant 0 : i32
    %c0_i32_0 = arith.constant 0 : i32
    return %c0_i32, %arg0 : i32, i32
  }
}

</mosaic_0001>

<bundles_post_ra>
// kernel: tpu_custom_call.1
= control target key start
LH: loop header
LB: loop body
LE: loop exit
PB: predicated region body
PF: predicated region fallthrough
CT: control target
= control target key end

     0   :  { %8 = vsyncpa [#allocation3], 0  ;;  %s303_s0 = inlined_call_operand.hbm [shape: f32[32,256], index: 0, kind: input, shape index: {}]   ;;  %s304_s1 = inlined_call_operand.hbm [shape: bf16[16,256], index: 1, kind: output, shape index: {0}]   ;;  %s305_s2 = inlined_call_operand.hbm [shape: bf16[16,256], index: 2, kind: output, shape index: {1}]  }
   0x1   :  { %9 = vsyncpa [#allocation4], 0 }
   0x2   :  { %10 = vsyncpa [#allocation7], 0  ;;  %s272_s9 = smov [#allocation2]  }
   0x3   :  { %s16_s10 = sshll.u32 %s272_s9, 4  ;;  %s17_s10 = int_to_ptr.vmem [resolvable:$true] %s16_s10 }
   0x4   :  { %s214_s11 = scalar_lea.vmem %s17_s10, 1024  ;;  %p219_p1 = scmp.lt.s32.totalorder %s17_s10, %s17_s10 }
   0x5   :  { %p215_p0 = scmp.ne.s32.totalorder %s17_s10, %s214_s11  ;;  %p220_p2 = scmp.lt.s32.totalorder %s214_s11, %s214_s11 }
   0x7   :  { %p221_p3 = por %p220_p2, %p219_p1 }
   0x9   :  { %p222_p4 = pnand %p221_p3, %p215_p0 }
   0xb   :  { %225 = shalt.err (!%p222_p4)
}
   0xc   :  { %s273_s12 = smov 256   ;;  %s274_s13 = smov 16  }
   0xd   :  { %22 = dma.hbm_to_vmem [thread:$0]  %s303_s0, 1024, %s17_s10, [#allocation3], %s273_s12, %s273_s12, %s274_s13  }
   0xe   :  { %266 = dma.done.wait [#allocation3], 1024  }
   0xf   :  { %267 = vsyncadd [#allocation3], 4294966272  ;;  %v26_v0 = vld [vmem:[#allocation2] sm:$0xff]  ;;  %v27_v1 = vld [vmem:[#allocation2 + $0x8] sm:$0xff]  ;;  %s275_s0 = smov [#allocation5]   ;;  %s276_s17 = smov [#allocation6]  }
  0x10   :  { %v28_v2 = vld [vmem:[#allocation2 + $0x10] sm:$0xff]  ;;  %v29_v3 = vld [vmem:[#allocation2 + $0x18] sm:$0xff]  ;;  %v30_v5 = vld [vmem:[#allocation2 + $0x20] sm:$0xff]  ;;  %s155_s16 = sshll.u32 %s275_s0, 4  ;;  %s167_s18 = sshll.u32 %s276_s17, 4  ;;  %s156_s16 = int_to_ptr.vmem [resolvable:$true] %s155_s16  ;;  %s168_s18 = int_to_ptr.vmem [resolvable:$true] %s167_s18 }
  0x11   :  { %v34_v4 = vadd.f32 %v28_v2, %v26_v0  ;;  %v31_v6 = vld [vmem:[#allocation2 + $0x28] sm:$0xff]  ;;  %v41_v7 = vadd.f32 %v29_v3, %v27_v1  ;;  %v32_v8 = vld [vmem:[#allocation2 + $0x30] sm:$0xff]  ;;  %v33_v9 = vld [vmem:[#allocation2 + $0x38] sm:$0xff]  ;;  %s226_s19 = scalar_lea.vmem %s156_s16, 256  ;;  %p231_p6 = scmp.lt.s32.totalorder %s156_s16, %s156_s16 }
  0x12   :  { %v92_v11 = vadd.f32 %v32_v8, %v30_v5  ;;  %v99_v12 = vadd.f32 %v33_v9, %v31_v6  ;;  %p227_p5 = scmp.ne.s32.totalorder %s156_s16, %s226_s19  ;;  %p232_p7 = scmp.lt.s32.totalorder %s226_s19, %s226_s19 }
  0x13   :  { %v35_v10 = vrot.slane %v34_v4, 4  ;;  %v42_v13 = vrot.slane %v41_v7, 4 }
  0x14   :  { %v93_v15 = vrot.slane %v92_v11, 4  ;;  %v100_v16 = vrot.slane %v99_v12, 4  ;;  %p233_p8 = por %p232_p7, %p231_p6 }
  0x15   :  { %v36_v14 = vadd.f32 %v35_v10, %v34_v4  ;;  %v43_v17 = vadd.f32 %v42_v13, %v41_v7 }
  0x16   :  { %v94_v19 = vadd.f32 %v93_v15, %v92_v11  ;;  %v101_v20 = vadd.f32 %v100_v16, %v99_v12  ;;  %p234_p9 = pnand %p233_p8, %p227_p5 }
  0x17   :  { %v37_v18 = vrot.slane %v36_v14, 2  ;;  %v44_v21 = vrot.slane %v43_v17, 2 }
  0x18   :  { %v95_v23 = vrot.slane %v94_v19, 2  ;;  %v102_v24 = vrot.slane %v101_v20, 2 }
  0x19   :  { %v38_v22 = vadd.f32 %v37_v18, %v36_v14  ;;  %v45_v25 = vadd.f32 %v44_v21, %v43_v17 }
  0x1a   :  { %v96_v27 = vadd.f32 %v95_v23, %v94_v19  ;;  %v103_v28 = vadd.f32 %v102_v24, %v101_v20 }
  0x1b   :  { %v39_v26 = vrot.slane %v38_v22, 1  ;;  %v46_v29 = vrot.slane %v45_v25, 1 }
  0x1c   :  { %v97_v31 = vrot.slane %v96_v27, 1  ;;  %v104_v32 = vrot.slane %v103_v28, 1 }
  0x1d   :  { %v40_v30 = vadd.f32 %v39_v26, %v38_v22  ;;  %v47_v33 = vadd.f32 %v46_v29, %v45_v25 }
  0x1e   :  { %v98_v35 = vadd.f32 %v97_v31, %v96_v27  ;;  %v105_v36 = vadd.f32 %v104_v32, %v103_v28 }
  0x1f   :  { %v48_v34 = vmul.f32 0.0625, %v40_v30  ;;  %v49_v37 = vmul.f32 0.0625, %v47_v33 }
  0x20   :  { %v106_v40 = vmul.f32 0.0625, %v98_v35  ;;  %v107_v41 = vmul.f32 0.0625, %v105_v36 }
  0x21   :  { %v50_v38 = vsub.f32 %v26_v0, %v48_v34  ;;  %v52_v39 = vsub.f32 %v28_v2, %v48_v34  ;;  %v51_v42 = vsub.f32 %v27_v1, %v49_v37  ;;  %v53_v43 = vsub.f32 %v29_v3, %v49_v37 }
  0x22   :  { %v108_v46 = vsub.f32 %v30_v5, %v106_v40  ;;  %v109_v47 = vsub.f32 %v31_v6, %v107_v41  ;;  %v110_v50 = vsub.f32 %v32_v8, %v106_v40  ;;  %v111_v51 = vsub.f32 %v33_v9, %v107_v41 }
  0x23   :  { %v54_v44 = vmul.f32 %v50_v38, %v50_v38  ;;  %v56_v45 = vmul.f32 %v52_v39, %v52_v39  ;;  %v55_v48 = vmul.f32 %v51_v42, %v51_v42  ;;  %v57_v49 = vmul.f32 %v53_v43, %v53_v43 }
  0x24   :  { %v112_v53 = vmul.f32 %v108_v46, %v108_v46  ;;  %v113_v54 = vmul.f32 %v109_v47, %v109_v47  ;;  %v114_v56 = vmul.f32 %v110_v50, %v110_v50  ;;  %v115_v57 = vmul.f32 %v111_v51, %v111_v51 }
  0x25   :  { %v58_v52 = vadd.f32 %v56_v45, %v54_v44  ;;  %v65_v55 = vadd.f32 %v57_v49, %v55_v48 }
  0x26   :  { %v116_v60 = vadd.f32 %v114_v56, %v112_v53  ;;  %v123_v61 = vadd.f32 %v115_v57, %v113_v54 }
  0x27   :  { %v59_v58 = vrot.slane %v58_v52, 4  ;;  %v66_v59 = vrot.slane %v65_v55, 4 }
  0x28   :  { %v117_v0 = vrot.slane %v116_v60, 4  ;;  %v124_v1 = vrot.slane %v123_v61, 4 }
  0x29   :  { %v60_v62 = vadd.f32 %v59_v58, %v58_v52  ;;  %v67_v63 = vadd.f32 %v66_v59, %v65_v55 }
  0x2a   :  { %v118_v4 = vadd.f32 %v117_v0, %v116_v60  ;;  %v125_v5 = vadd.f32 %v124_v1, %v123_v61 }
  0x2b   :  { %v61_v2 = vrot.slane %v60_v62, 2  ;;  %v68_v3 = vrot.slane %v67_v63, 2 }
  0x2c   :  { %v119_v8 = vrot.slane %v118_v4, 2  ;;  %v126_v9 = vrot.slane %v125_v5, 2 }
  0x2d   :  { %v62_v6 = vadd.f32 %v61_v2, %v60_v62  ;;  %v69_v7 = vadd.f32 %v68_v3, %v67_v63 }
  0x2e   :  { %v120_v12 = vadd.f32 %v119_v8, %v118_v4  ;;  %v127_v13 = vadd.f32 %v126_v9, %v125_v5 }
  0x2f   :  { %v63_v10 = vrot.slane %v62_v6, 1  ;;  %v70_v11 = vrot.slane %v69_v7, 1 }
  0x30   :  { %v121_v16 = vrot.slane %v120_v12, 1  ;;  %v128_v17 = vrot.slane %v127_v13, 1 }
  0x31   :  { %v64_v14 = vadd.f32 %v63_v10, %v62_v6  ;;  %v71_v15 = vadd.f32 %v70_v11, %v69_v7 }
  0x32   :  { %v122_v18 = vadd.f32 %v121_v16, %v120_v12  ;;  %v129_v19 = vadd.f32 %v128_v17, %v127_v13 }
  0x33   :  { %198 = vrsqrt.f32 %v64_v14 }
  0x34   :  { %200 = vrsqrt.f32 %v71_v15 }
  0x35   :  { %202 = vrsqrt.f32 %v122_v18 }
  0x36   :  { %204 = vrsqrt.f32 %v129_v19 }
  0x40   :  { %v199_v20 = vpop.eup %198 }
  0x41   :  { %v201_v21 = vpop.eup %200  ;;  %v74_v22 = vmul.f32 %v199_v20, %v50_v38  ;;  %v76_v23 = vmul.f32 %v199_v20, %v52_v39 }
  0x42   :  { %v75_v24 = vmul.f32 %v201_v21, %v51_v42  ;;  %v77_v25 = vmul.f32 %v201_v21, %v53_v43  ;;  %v203_v26 = vpop.eup %202 }
  0x43   :  { %v205_v27 = vpop.eup %204  ;;  %v132_v30 = vmul.f32 %v203_v26, %v108_v46  ;;  %v134_v31 = vmul.f32 %v203_v26, %v110_v50 }
  0x44   :  { %v187_v28 = vpack.c.bf16 %v75_v24, %v74_v22  ;;  %v188_v29 = vpack.c.bf16 %v77_v25, %v76_v23  ;;  %v133_v32 = vmul.f32 %v205_v27, %v109_v47  ;;  %v135_v33 = vmul.f32 %v205_v27, %v111_v51 }
  0x46   :  { %90 = vst [vmem:[#allocation5] sm:$0xff] %v187_v28  ;;  %91 = vst [vmem:[#allocation5 + $0x8] sm:$0xff] %v188_v29  ;;  %v189_v34 = vpack.c.bf16 %v133_v32, %v132_v30  ;;  %v190_v35 = vpack.c.bf16 %v135_v33, %v134_v31 }
  0x47   :  { %237 = shalt.err (!%p234_p9)
}
  0x48   :  { %s277_s20 = smov 128   ;;  %s278_s21 = smov 8   ;;  %148 = vst [vmem:[#allocation6] sm:$0xff] %v189_v34  ;;  %149 = vst [vmem:[#allocation6 + $0x8] sm:$0xff] %v190_v35 }
  0x49   :  { %161 = dma.vmem_to_hbm [thread:$0]  %s156_s16, 256, %s304_s1, [#allocation4], %s277_s20, %s277_s20, %s278_s21  }
  0x4a   :  { %s246_s24 = scalar_lea.vmem %s168_s18, 256  ;;  %p251_p11 = scmp.lt.s32.totalorder %s168_s18, %s168_s18 }
  0x4b   :  { %p247_p10 = scmp.ne.s32.totalorder %s168_s18, %s246_s24  ;;  %p252_p12 = scmp.lt.s32.totalorder %s246_s24, %s246_s24 }
  0x4d   :  { %p253_p13 = por %p252_p12, %p251_p11 }
  0x4f   :  { %p254_p0 = pnand %p253_p13, %p247_p10 }
  0x51   :  { %257 = shalt.err (!%p254_p0)
}
  0x52   :  { %173 = dma.vmem_to_hbm [thread:$0]  %s168_s18, 256, %s305_s2, [#allocation7], %s277_s20, %s277_s20, %s278_s21  }
  0x53   :  { %268 = dma.done.wait [#allocation4], 256  }
  0x54   :  { %269 = vsyncadd [#allocation4], 4294967040 }
  0x55   :  { %270 = dma.done.wait [#allocation7], 256  }
  0x56   :  { %271 = vsyncadd [#allocation7], 4294967040 }
  0x57   :  { %180 = vsyncpa [#allocation3], 1 }
  0x58   :  { %181 = vsyncpa [#allocation4], 1 }
  0x59   :  { %182 = vsyncpa [#allocation7], 1 }

</bundles_post_ra>
